<compile_context>
chip_gen: v5e
topology: v5e:2x2
jax: 0.10.0
libtpu: 0.0.40
codegen_flags: <defaults>
</compile_context>

<pallas_src>
import functools

import numpy as np
import jax
import jax.numpy as jnp
from jax.experimental import pallas as pl
from jax.experimental.pallas import tpu as pltpu

# ----------------------------------------------------------------------------
# Configuration (consistent with the module's constructor)
# ----------------------------------------------------------------------------
DEGREES = 3
MATRIX_DIMS = (DEGREES + 1) ** 2            # 16
REP_COPIES = 8
IN_DIMS = MATRIX_DIMS * REP_COPIES          # 128 (flattened toy-encoder input)
ENC_HIDDEN = 100                            # hard-coded in VAE.__init__ (toy encoder MLP)
ENC_LAYERS = 2                              # hard-coded in VAE.__init__
GROUP_DIMS_IN = 10                          # group_reparam_in_dims
NORMAL_DIMS = 3                             # latent z dims (Nreparameterize z_dim)
DEC_HIDDEN = 50                             # mlp_hidden default
DEC_LAYERS = 3                              # mlp_layers default
OUT_DIM = MATRIX_DIMS * REP_COPIES          # decoder output = prod(out_shape) = 128

# Lane/sublane-friendly padded dims (zero padding, numerically exact).
FEAT_PAD = 128
NORMAL_PAD = 8

# Packed-parameter row indices: weight pack (NUM_W,128,128), bias pack (NUM_B,128).
W_ENC1, W_ENC2, W_A, W_SIG, W_DEC2, W_DEC3, W_DEC4 = range(7)
NUM_W = 7
NUM_B = 8                                   # last bias row is zero padding (sublane alignment)


def _round_up(x, m):
    return ((x + m - 1) // m) * m


# ----------------------------------------------------------------------------
# Pallas kernel: whole forward pass for one batch tile.
# ----------------------------------------------------------------------------
def vae_forward_kernel(x_ref, eps_ref, w_ref, wz_ref, b_ref, out_ref, *, compute_dtype):
    # Activations are (rows, features) with features on the lane axis. Weights are
    # stored (in_features, out_features) so y = x @ W + b. Biases stay f32.
    biases = b_ref[...]                                     # (NUM_B, 128) f32, one vreg

    def linear(v, k):
        # MXU matmul in compute_dtype (bf16 on v6e/v7x), f32 accumulate, f32 bias add.
        return (jnp.dot(v, w_ref[k], preferred_element_type=jnp.float32)
                + biases[k:k + 1, :])

    def relu_c(v):
        # ReLU in f32, then carry the activation in compute_dtype between layers.
        return jnp.maximum(v, 0.0).astype(compute_dtype)

    # --- toy encoder trunk: Flatten (wrapper) + 2x (Linear -> ReLU), 128-lane dense.
    h = relu_c(linear(x_ref[...], W_ENC1))
    h = relu_c(linear(h, W_ENC2))

    # --- deterministic path: encoder tail + mu head + decoder layer 1, all folded
    #     offline into one full 128x128 matmul per batch row:
    #       a = h @ W_A + b_A  ==  mu @ Wdec1 + bdec1
    a = linear(h, W_A)                                      # (TB, 128) f32

    # --- sigma head (encoder tail folded in); only the first NORMAL_PAD lanes are real.
    pre = linear(h, W_SIG)[:, :NORMAL_PAD]                  # (TB, 8) f32
    sigma = jnp.where(pre > 20.0, pre,
                      jnp.log1p(jnp.exp(jnp.minimum(pre, 20.0))))   # torch softplus, thr=20

    # --- stochastic part of decoder layer 1, all n samples fused into one matmul:
    #     (eps * sigma) @ Wdec1   (padded eps/sigma lanes hit zero rows of Wdec1)
    n, tb, _ = eps_ref.shape
    s = (eps_ref[...].astype(jnp.float32) * sigma[None, :, :]).astype(compute_dtype)
    zs = jnp.dot(s.reshape(n * tb, NORMAL_PAD), wz_ref[...],
                 preferred_element_type=jnp.float32)        # (n*TB, 128) f32
    d = relu_c(zs.reshape(n, tb, FEAT_PAD) + a[None, :, :]).reshape(n * tb, FEAT_PAD)

    # --- remaining decoder layers (deconv = identity in 'toy' mode).
    d = relu_c(linear(d, W_DEC2))
    d = relu_c(linear(d, W_DEC3))
    d = linear(d, W_DEC4)                                   # (n*TB, OUT_DIM) f32

    out_ref[...] = d.reshape(n, tb, OUT_DIM).astype(out_ref.dtype)


# ----------------------------------------------------------------------------
# Parameter construction (deterministic, PyTorch nn.Linear-style init)
# ----------------------------------------------------------------------------
def init_linear(key, fan_in, fan_out):
    kw, kb = jax.random.split(key)
    bound = 1.0 / np.sqrt(fan_in)
    w = jax.random.uniform(kw, (fan_in, fan_out), jnp.float32, -bound, bound)
    b = jax.random.uniform(kb, (fan_out,), jnp.float32, -bound, bound)
    return w, b


def init_params(key):
    enc_dims = [IN_DIMS] + [ENC_HIDDEN] * ENC_LAYERS + [GROUP_DIMS_IN]
    dec_dims = [NORMAL_DIMS] + [DEC_HIDDEN] * DEC_LAYERS + [OUT_DIM]
    keys = iter(jax.random.split(key, 2 + len(enc_dims) + len(dec_dims)))
    return {
        "enc": [init_linear(next(keys), a, b) for a, b in zip(enc_dims[:-1], enc_dims[1:])],
        "mu": init_linear(next(keys), GROUP_DIMS_IN, NORMAL_DIMS),
        "sigma": init_linear(next(keys), GROUP_DIMS_IN, NORMAL_DIMS),
        "dec": [init_linear(next(keys), a, b) for a, b in zip(dec_dims[:-1], dec_dims[1:])],
    }


# ----------------------------------------------------------------------------
# Parameter prep: fold encoder tail into heads and the mu path through decoder
# layer 1, zero-pad to lane-dense shapes, pack into 3 arrays (3 DMA streams).
# ----------------------------------------------------------------------------
def _pad2(w, rows, cols):
    return jnp.pad(w, ((0, rows - w.shape[0]), (0, cols - w.shape[1])))


def _pad1(b, cols):
    return jnp.pad(b, (0, cols - b.shape[0]))


def prepare_params(params, compute_dtype):
    (w1, b1), (w2, b2), (w3, b3) = params["enc"]
    wmu, bmu = params["mu"]
    wsg, bsg = params["sigma"]
    wd1, bd1 = params["dec"][0]

    # Fold the last encoder Linear (no activation after it) into the heads.
    wmu_f, bmu_f = w3 @ wmu, b3 @ wmu + bmu                 # (100,3), (3,)
    wsg_f, bsg_f = w3 @ wsg, b3 @ wsg + bsg

    # Fold the deterministic (mu) path through decoder layer 1:
    #   mu @ Wd1 + bd1 == h @ (Wmu_f @ Wd1) + (bmu_f @ Wd1 + bd1)
    w_a, b_a = wmu_f @ wd1, bmu_f @ wd1 + bd1               # (100,50), (50,)

    def pw(w):
        return _pad2(w.astype(jnp.float32), FEAT_PAD, FEAT_PAD)

    def pb(b):
        return _pad1(b.astype(jnp.float32), FEAT_PAD)

    dec_ws = [w for w, _ in params["dec"][1:]]
    dec_bs = [b for _, b in params["dec"][1:]]

    # Order must match W_ENC1..W_DEC4 / bias rows 0..6.
    w_pack = jnp.stack([pw(w1), pw(w2), pw(w_a), pw(wsg_f)]
                       + [pw(w) for w in dec_ws]).astype(compute_dtype)      # (7,128,128)
    wz = _pad2(wd1.astype(jnp.float32), NORMAL_PAD, FEAT_PAD).astype(compute_dtype)  # (8,128)
    b_pack = jnp.stack([pb(b1), pb(b2), pb(b_a), pb(bsg_f)]
                       + [pb(b) for b in dec_bs]
                       + [jnp.zeros((FEAT_PAD,), jnp.float32)])              # (8,128) f32
    return w_pack, wz, b_pack


# ----------------------------------------------------------------------------
# Wrapper
# ----------------------------------------------------------------------------
def vae_forward(x, eps, params, *, compute_dtype=jnp.bfloat16, tile_b=512):
    """x: (B, matrix_dims, rep_copies), eps: (n, B, normal_dims) pre-sampled N(0,1).
    Returns (n, B, matrix_dims, rep_copies) in compute_dtype."""
    B = x.shape[0]
    n = eps.shape[0]

    # Batch tile: multiple of 16 sublanes (bf16-safe) and, when B allows, at least
    # two grid steps so both TensorCores get work on v7x ("parallel" grid axis).
    tb = min(tile_b, max(16, _round_up(-(-B // 2), 16)))
    b_pad = _round_up(B, tb)

    x_flat = x.reshape(B, -1).astype(jnp.float32)                     # Flatten()
    x_flat = jnp.pad(x_flat, ((0, b_pad - B), (0, 0))).astype(compute_dtype)
    eps_p = jnp.pad(eps.astype(jnp.float32),
                    ((0, 0), (0, b_pad - B), (0, NORMAL_PAD - NORMAL_DIMS))
                    ).astype(compute_dtype)

    w_pack, wz, b_pack = prepare_params(params, compute_dtype)

    in_specs = [
        pl.BlockSpec((tb, IN_DIMS), lambda i: (i, 0)),                 # x tile
        pl.BlockSpec((n, tb, NORMAL_PAD), lambda i: (0, i, 0)),        # eps tile
        pl.BlockSpec((NUM_W, FEAT_PAD, FEAT_PAD), lambda i: (0, 0, 0)),  # weights (resident)
        pl.BlockSpec((NORMAL_PAD, FEAT_PAD), lambda i: (0, 0)),        # dec1 stochastic W
        pl.BlockSpec((NUM_B, FEAT_PAD), lambda i: (0, 0)),             # packed biases
    ]
    out_specs = pl.BlockSpec((n, tb, OUT_DIM), lambda i: (0, i, 0))

    itemsize = np.dtype(compute_dtype).itemsize
    flops = int(2 * b_pad * 4 * FEAT_PAD * FEAT_PAD
                + 2 * n * b_pad * (NORMAL_PAD * FEAT_PAD + 3 * FEAT_PAD * FEAT_PAD))
    bytes_accessed = int(x_flat.size * itemsize + eps_p.size * itemsize
                         + n * b_pad * OUT_DIM * itemsize
                         + (w_pack.size + wz.size) * itemsize + b_pack.size * 4)
    cost = pl.CostEstimate(flops=flops,
                           transcendentals=int(2 * b_pad * NORMAL_PAD),
                           bytes_accessed=bytes_accessed)

    kernel = functools.partial(vae_forward_kernel, compute_dtype=compute_dtype)

    out = pl.pallas_call(
        kernel,
        out_shape=jax.ShapeDtypeStruct((n, b_pad, OUT_DIM), compute_dtype),
        grid=(b_pad // tb,),
        in_specs=in_specs,
        out_specs=out_specs,
        compiler_params=pltpu.CompilerParams(
            dimension_semantics=("parallel",),     # shards batch tiles across TCs on v7x
            vmem_limit_bytes=64 * 1024 * 1024,
        ),
        cost_estimate=cost,
    )(x_flat, eps_p, w_pack, wz, b_pack)

    # VAE.decode(): x_recon.reshape(*batch_dims, *self.out_shape); drop batch padding.
    return out[:, :B].reshape(n, B, MATRIX_DIMS, REP_COPIES)


# Pure-JAX reference for correctness checking (original, unpadded, unfused math)
def vae_forward_ref(x, eps, params):
    B = x.shape[0]
    n = eps.shape[0]
    h = x.reshape(B, -1)
    for i, (w, b) in enumerate(params["enc"]):
        h = h @ w + b
        if i < len(params["enc"]) - 1:
            h = jnp.maximum(h, 0.0)
    wmu, bmu = params["mu"]
    wsg, bsg = params["sigma"]
    mu = h @ wmu + bmu
    sigma = jax.nn.softplus(h @ wsg + bsg)
    z = mu[None] + eps * sigma[None]                                  # (n, B, 3)
    d = z.reshape(n * B, NORMAL_DIMS)
    for i, (w, b) in enumerate(params["dec"]):
        d = d @ w + b
        if i < len(params["dec"]) - 1:
            d = jnp.maximum(d, 0.0)
    return d.reshape(n, B, MATRIX_DIMS, REP_COPIES)


if __name__ == "__main__":
    key = jax.random.PRNGKey(0)
    kp, kx, ke = jax.random.split(key, 3)
    params = init_params(kp)

    B, n = 2, 2
    x = jax.random.normal(kx, (B, MATRIX_DIMS, REP_COPIES), jnp.float32)
    eps = jax.random.normal(ke, (n, B, NORMAL_DIMS), jnp.float32)

    ref = vae_forward_ref(x, eps, params)

    # f32 compute path: checks padding + all weight folding are exact (up to reassociation).
    out_f32 = jax.block_until_ready(vae_forward(x, eps, params, compute_dtype=jnp.float32))
    assert out_f32.shape == (n, B, MATRIX_DIMS, REP_COPIES), out_f32.shape
    np.testing.assert_allclose(np.asarray(out_f32), np.asarray(ref), rtol=1e-3, atol=1e-3)

    # bf16 compute/output path (default; MXU-native on v6e/v7x) with looser tolerance.
    out_bf16 = jax.block_until_ready(vae_forward(x, eps, params, compute_dtype=jnp.bfloat16))
    assert out_bf16.shape == (n, B, MATRIX_DIMS, REP_COPIES), out_bf16.shape
    np.testing.assert_allclose(np.asarray(out_bf16.astype(jnp.float32)), np.asarray(ref),
                               rtol=5e-2, atol=5e-2)

    print("KERNEL_OK")
</pallas_src>

<mosaic_0001>
module attributes {stable_mosaic.version = 11 : i64} {
  func.func @vae_forward_kernel(%arg0: i32, %arg1: memref<16x128xf32, #tpu.memory_space<vmem>>, %arg2: memref<2x16x8xf32, #tpu.memory_space<vmem>>, %arg3: memref<7x128x128xf32, #tpu.memory_space<vmem>>, %arg4: memref<8x128xf32, #tpu.memory_space<vmem>>, %arg5: memref<8x128xf32, #tpu.memory_space<vmem>>, %arg6: memref<2x16x128xf32, #tpu.memory_space<vmem>>) attributes {dimension_semantics = [#tpu.dimension_semantics<parallel>], iteration_bounds = array<i64: 1>, scalar_prefetch = 0 : i64, scratch_operands = 0 : i64, tpu.core_type = #tpu.core_type<tc>, window_params = [{transform_indices = @transform_0, window_bounds = array<i64: 16, 128>}, {transform_indices = @transform_1, window_bounds = array<i64: 2, 16, 8>}, {pipeline_mode = #tpu.pipeline_mode<synchronous>, transform_indices = @transform_2, window_bounds = array<i64: 7, 128, 128>}, {pipeline_mode = #tpu.pipeline_mode<synchronous>, transform_indices = @transform_3, window_bounds = array<i64: 8, 128>}, {pipeline_mode = #tpu.pipeline_mode<synchronous>, transform_indices = @transform_4, window_bounds = array<i64: 8, 128>}, {transform_indices = @transform_5, window_bounds = array<i64: 2, 16, 128>}]} {
    %c0 = arith.constant 0 : index
    %c0_0 = arith.constant 0 : index
    %0 = vector.load %arg5[%c0, %c0_0] : memref<8x128xf32, #tpu.memory_space<vmem>>, vector<8x128xf32>
    %c0_1 = arith.constant 0 : index
    %c0_2 = arith.constant 0 : index
    %1 = vector.load %arg1[%c0_1, %c0_2] : memref<16x128xf32, #tpu.memory_space<vmem>>, vector<16x128xf32>
    %c0_3 = arith.constant 0 : index
    %c0_4 = arith.constant 0 : index
    %c0_5 = arith.constant 0 : index
    %2 = vector.load %arg3[%c0_3, %c0_4, %c0_5] : memref<7x128x128xf32, #tpu.memory_space<vmem>>, vector<1x128x128xf32>
    %3 = vector.shape_cast %2 : vector<1x128x128xf32> to vector<128x128xf32>
    %cst = arith.constant dense<0.000000e+00> : vector<16x128xf32>
    %4 = tpu.matmul %1, %3, %cst {dimension_numbers = #tpu.dot_dimension_numbers<[1], [0], [0], [1], [0, 0, 1, 1], [], []>} : vector<16x128xf32>, vector<128x128xf32>, vector<16x128xf32> -> vector<16x128xf32>
    %5 = vector.extract_strided_slice %0 {offsets = [0, 0], sizes = [1, 128], strides = [1, 1]} : vector<8x128xf32> to vector<1x128xf32>
    %6 = vector.broadcast %5 : vector<1x128xf32> to vector<16x128xf32>
    %7 = arith.addf %4, %6 : vector<16x128xf32>
    %cst_6 = arith.constant 0.000000e+00 : f32
    %8 = vector.broadcast %cst_6 : f32 to vector<16x128xf32>
    %9 = arith.maximumf %7, %8 : vector<16x128xf32>
    %c1 = arith.constant 1 : index
    %c0_7 = arith.constant 0 : index
    %c0_8 = arith.constant 0 : index
    %10 = vector.load %arg3[%c1, %c0_7, %c0_8] : memref<7x128x128xf32, #tpu.memory_space<vmem>>, vector<1x128x128xf32>
    %11 = vector.shape_cast %10 : vector<1x128x128xf32> to vector<128x128xf32>
    %cst_9 = arith.constant dense<0.000000e+00> : vector<16x128xf32>
    %12 = tpu.matmul %9, %11, %cst_9 {dimension_numbers = #tpu.dot_dimension_numbers<[1], [0], [0], [1], [0, 0, 1, 1], [], []>} : vector<16x128xf32>, vector<128x128xf32>, vector<16x128xf32> -> vector<16x128xf32>
    %13 = vector.extract_strided_slice %0 {offsets = [1, 0], sizes = [1, 128], strides = [1, 1]} : vector<8x128xf32> to vector<1x128xf32>
    %14 = vector.broadcast %13 : vector<1x128xf32> to vector<16x128xf32>
    %15 = arith.addf %12, %14 : vector<16x128xf32>
    %cst_10 = arith.constant 0.000000e+00 : f32
    %16 = vector.broadcast %cst_10 : f32 to vector<16x128xf32>
    %17 = arith.maximumf %15, %16 : vector<16x128xf32>
    %c2 = arith.constant 2 : index
    %c0_11 = arith.constant 0 : index
    %c0_12 = arith.constant 0 : index
    %18 = vector.load %arg3[%c2, %c0_11, %c0_12] : memref<7x128x128xf32, #tpu.memory_space<vmem>>, vector<1x128x128xf32>
    %19 = vector.shape_cast %18 : vector<1x128x128xf32> to vector<128x128xf32>
    %cst_13 = arith.constant dense<0.000000e+00> : vector<16x128xf32>
    %20 = tpu.matmul %17, %19, %cst_13 {dimension_numbers = #tpu.dot_dimension_numbers<[1], [0], [0], [1], [0, 0, 1, 1], [], []>} : vector<16x128xf32>, vector<128x128xf32>, vector<16x128xf32> -> vector<16x128xf32>
    %21 = vector.extract_strided_slice %0 {offsets = [2, 0], sizes = [1, 128], strides = [1, 1]} : vector<8x128xf32> to vector<1x128xf32>
    %22 = vector.broadcast %21 : vector<1x128xf32> to vector<16x128xf32>
    %23 = arith.addf %20, %22 : vector<16x128xf32>
    %c3 = arith.constant 3 : index
    %c0_14 = arith.constant 0 : index
    %c0_15 = arith.constant 0 : index
    %24 = vector.load %arg3[%c3, %c0_14, %c0_15] : memref<7x128x128xf32, #tpu.memory_space<vmem>>, vector<1x128x128xf32>
    %25 = vector.shape_cast %24 : vector<1x128x128xf32> to vector<128x128xf32>
    %cst_16 = arith.constant dense<0.000000e+00> : vector<16x128xf32>
    %26 = tpu.matmul %17, %25, %cst_16 {dimension_numbers = #tpu.dot_dimension_numbers<[1], [0], [0], [1], [0, 0, 1, 1], [], []>} : vector<16x128xf32>, vector<128x128xf32>, vector<16x128xf32> -> vector<16x128xf32>
    %27 = vector.extract_strided_slice %0 {offsets = [3, 0], sizes = [1, 128], strides = [1, 1]} : vector<8x128xf32> to vector<1x128xf32>
    %28 = vector.broadcast %27 : vector<1x128xf32> to vector<16x128xf32>
    %29 = arith.addf %26, %28 : vector<16x128xf32>
    %30 = vector.extract_strided_slice %29 {offsets = [0, 0], sizes = [16, 8], strides = [1, 1]} : vector<16x128xf32> to vector<16x8xf32>
    %cst_17 = arith.constant 2.000000e+01 : f32
    %31 = vector.broadcast %cst_17 : f32 to vector<16x8xf32>
    %32 = arith.cmpf ogt, %30, %31 : vector<16x8xf32>
    %cst_18 = arith.constant 2.000000e+01 : f32
    %33 = vector.broadcast %cst_18 : f32 to vector<16x8xf32>
    %34 = arith.minimumf %30, %33 : vector<16x8xf32>
    %35 = math.exp %34 : vector<16x8xf32>
    %36 = math.log1p %35 : vector<16x8xf32>
    %37 = arith.select %32, %30, %36 : vector<16x8xi1>, vector<16x8xf32>
    %c0_19 = arith.constant 0 : index
    %c0_20 = arith.constant 0 : index
    %c0_21 = arith.constant 0 : index
    %38 = vector.load %arg2[%c0_19, %c0_20, %c0_21] : memref<2x16x8xf32, #tpu.memory_space<vmem>>, vector<2x16x8xf32>
    %39 = vector.shape_cast %37 : vector<16x8xf32> to vector<1x16x8xf32>
    %40 = vector.broadcast %39 : vector<1x16x8xf32> to vector<2x16x8xf32>
    %41 = arith.mulf %38, %40 : vector<2x16x8xf32>
    %42 = vector.shape_cast %41 : vector<2x16x8xf32> to vector<32x8xf32>
    %c0_22 = arith.constant 0 : index
    %c0_23 = arith.constant 0 : index
    %43 = vector.load %arg4[%c0_22, %c0_23] : memref<8x128xf32, #tpu.memory_space<vmem>>, vector<8x128xf32>
    %cst_24 = arith.constant dense<0.000000e+00> : vector<32x128xf32>
    %44 = tpu.matmul %42, %43, %cst_24 {dimension_numbers = #tpu.dot_dimension_numbers<[1], [0], [0], [1], [0, 0, 1, 1], [], []>} : vector<32x8xf32>, vector<8x128xf32>, vector<32x128xf32> -> vector<32x128xf32>
    %45 = vector.shape_cast %44 : vector<32x128xf32> to vector<2x16x128xf32>
    %46 = vector.shape_cast %23 : vector<16x128xf32> to vector<1x16x128xf32>
    %47 = vector.broadcast %46 : vector<1x16x128xf32> to vector<2x16x128xf32>
    %48 = arith.addf %45, %47 : vector<2x16x128xf32>
    %cst_25 = arith.constant 0.000000e+00 : f32
    %49 = vector.broadcast %cst_25 : f32 to vector<2x16x128xf32>
    %50 = arith.maximumf %48, %49 : vector<2x16x128xf32>
    %51 = vector.shape_cast %50 : vector<2x16x128xf32> to vector<32x128xf32>
    %c4 = arith.constant 4 : index
    %c0_26 = arith.constant 0 : index
    %c0_27 = arith.constant 0 : index
    %52 = vector.load %arg3[%c4, %c0_26, %c0_27] : memref<7x128x128xf32, #tpu.memory_space<vmem>>, vector<1x128x128xf32>
    %53 = vector.shape_cast %52 : vector<1x128x128xf32> to vector<128x128xf32>
    %cst_28 = arith.constant dense<0.000000e+00> : vector<32x128xf32>
    %54 = tpu.matmul %51, %53, %cst_28 {dimension_numbers = #tpu.dot_dimension_numbers<[1], [0], [0], [1], [0, 0, 1, 1], [], []>} : vector<32x128xf32>, vector<128x128xf32>, vector<32x128xf32> -> vector<32x128xf32>
    %55 = vector.extract_strided_slice %0 {offsets = [4, 0], sizes = [1, 128], strides = [1, 1]} : vector<8x128xf32> to vector<1x128xf32>
    %56 = vector.broadcast %55 : vector<1x128xf32> to vector<32x128xf32>
    %57 = arith.addf %54, %56 : vector<32x128xf32>
    %cst_29 = arith.constant 0.000000e+00 : f32
    %58 = vector.broadcast %cst_29 : f32 to vector<32x128xf32>
    %59 = arith.maximumf %57, %58 : vector<32x128xf32>
    %c5 = arith.constant 5 : index
    %c0_30 = arith.constant 0 : index
    %c0_31 = arith.constant 0 : index
    %60 = vector.load %arg3[%c5, %c0_30, %c0_31] : memref<7x128x128xf32, #tpu.memory_space<vmem>>, vector<1x128x128xf32>
    %61 = vector.shape_cast %60 : vector<1x128x128xf32> to vector<128x128xf32>
    %cst_32 = arith.constant dense<0.000000e+00> : vector<32x128xf32>
    %62 = tpu.matmul %59, %61, %cst_32 {dimension_numbers = #tpu.dot_dimension_numbers<[1], [0], [0], [1], [0, 0, 1, 1], [], []>} : vector<32x128xf32>, vector<128x128xf32>, vector<32x128xf32> -> vector<32x128xf32>
    %63 = vector.extract_strided_slice %0 {offsets = [5, 0], sizes = [1, 128], strides = [1, 1]} : vector<8x128xf32> to vector<1x128xf32>
    %64 = vector.broadcast %63 : vector<1x128xf32> to vector<32x128xf32>
    %65 = arith.addf %62, %64 : vector<32x128xf32>
    %cst_33 = arith.constant 0.000000e+00 : f32
    %66 = vector.broadcast %cst_33 : f32 to vector<32x128xf32>
    %67 = arith.maximumf %65, %66 : vector<32x128xf32>
    %c6 = arith.constant 6 : index
    %c0_34 = arith.constant 0 : index
    %c0_35 = arith.constant 0 : index
    %68 = vector.load %arg3[%c6, %c0_34, %c0_35] : memref<7x128x128xf32, #tpu.memory_space<vmem>>, vector<1x128x128xf32>
    %69 = vector.shape_cast %68 : vector<1x128x128xf32> to vector<128x128xf32>
    %cst_36 = arith.constant dense<0.000000e+00> : vector<32x128xf32>
    %70 = tpu.matmul %67, %69, %cst_36 {dimension_numbers = #tpu.dot_dimension_numbers<[1], [0], [0], [1], [0, 0, 1, 1], [], []>} : vector<32x128xf32>, vector<128x128xf32>, vector<32x128xf32> -> vector<32x128xf32>
    %71 = vector.extract_strided_slice %0 {offsets = [6, 0], sizes = [1, 128], strides = [1, 1]} : vector<8x128xf32> to vector<1x128xf32>
    %72 = vector.broadcast %71 : vector<1x128xf32> to vector<32x128xf32>
    %73 = arith.addf %70, %72 : vector<32x128xf32>
    %74 = vector.shape_cast %73 : vector<32x128xf32> to vector<2x16x128xf32>
    %c0_37 = arith.constant 0 : index
    %c0_38 = arith.constant 0 : index
    %c0_39 = arith.constant 0 : index
    %75 = vector.load %arg6[%c0_37, %c0_38, %c0_39] : memref<2x16x128xf32, #tpu.memory_space<vmem>>, vector<2x16x128xf32>
    tpu.vector_store %arg6[%c0_37, %c0_38, %c0_39], %74 {strides = array<i32>} : memref<2x16x128xf32, #tpu.memory_space<vmem>>, vector<2x16x128xf32>,
    return
  }
  func.func @transform_0(%arg0: i32) -> (i32, i32) {
    %c0_i32 = arith.constant 0 : i32
    %c0_i32_0 = arith.constant 0 : i32
    return %arg0, %c0_i32 : i32, i32
  }
  func.func @transform_1(%arg0: i32) -> (i32, i32, i32) {
    %c0_i32 = arith.constant 0 : i32
    %c0_i32_0 = arith.constant 0 : i32
    %c0_i32_1 = arith.constant 0 : i32
    return %c0_i32, %arg0, %c0_i32_0 : i32, i32, i32
  }
  func.func @transform_2(%arg0: i32) -> (i32, i32, i32) {
    %c0_i32 = arith.constant 0 : i32
    %c0_i32_0 = arith.constant 0 : i32
    %c0_i32_1 = arith.constant 0 : i32
    %c0_i32_2 = arith.constant 0 : i32
    return %c0_i32, %c0_i32_0, %c0_i32_1 : i32, i32, i32
  }
  func.func @transform_3(%arg0: i32) -> (i32, i32) {
    %c0_i32 = arith.constant 0 : i32
    %c0_i32_0 = arith.constant 0 : i32
    %c0_i32_1 = arith.constant 0 : i32
    return %c0_i32, %c0_i32_0 : i32, i32
  }
  func.func @transform_4(%arg0: i32) -> (i32, i32) {
    %c0_i32 = arith.constant 0 : i32
    %c0_i32_0 = arith.constant 0 : i32
    %c0_i32_1 = arith.constant 0 : i32
    return %c0_i32, %c0_i32_0 : i32, i32
  }
  func.func @transform_5(%arg0: i32) -> (i32, i32, i32) {
    %c0_i32 = arith.constant 0 : i32
    %c0_i32_0 = arith.constant 0 : i32
    %c0_i32_1 = arith.constant 0 : i32
    return %c0_i32, %arg0, %c0_i32_0 : i32, i32, i32
  }
}

</mosaic_0001>

<bundles_post_ra>
// kernel: tpu_custom_call.1
= control target key start
LH: loop header
LB: loop body
LE: loop exit
PB: predicated region body
PF: predicated region fallthrough
CT: control target
= control target key end

     0   :  { %10 = vsyncpa [#allocation3], 0  ;;  %s617_s0 = inlined_call_operand.vmem [shape: f32[16,128], index: 0, kind: input, shape index: {}]   ;;  %s618_s1 = inlined_call_operand.vmem [shape: f32[2,16,8], index: 1, kind: input, shape index: {}]   ;;  %s619_s2 = inlined_call_operand.hbm [shape: f32[7,128,128], index: 2, kind: input, shape index: {}]   ;;  %s620_s3 = inlined_call_operand.vmem [shape: f32[8,128], index: 3, kind: input, shape index: {}]   ;;  %s621_s4 = inlined_call_operand.vmem [shape: f32[8,128], index: 4, kind: input, shape index: {}]   ;;  %s622_s5 = inlined_call_operand.hbm [shape: f32[2,16,128], index: 5, kind: output, shape index: {}]  }
   0x1   :  { %11 = vsyncpa [#allocation4], 0  ;;  %s20_s20 = sshll.u32 %s619_s2, 4  ;;  %s534_s21 = smov [#allocation2]   ;;  %s21_s20 = int_to_ptr.hbm [resolvable:$true] %s20_s20 }
   0x2   :  { %s22_s22 = sshll.u32 %s534_s21, 4  ;;  %s535_s23 = smov 128   ;;  %s23_s22 = int_to_ptr.vmem [resolvable:$true] %s22_s22 }
   0x3   :  { %s536_s24 = smov 8  }
   0x4   :  { %28 = dma.hbm_to_vmem [thread:$0]  %s21_s20, 14336, %s23_s22, [#allocation3], %s535_s23, %s535_s23, %s536_s24  }
   0x5   :  { %530 = dma.done.wait [#allocation3], 14336  }
   0x6   :  { %531 = vsyncadd [#allocation3], 4294952960  ;;  %v55_v0 = vld [vmem:[#allocation2 + $0x78] sm:$0xff]  ;;  %v54_v1 = vld [vmem:[#allocation2 + $0x70] sm:$0xff]  ;;  %vm244_vm2 = vcmask 64512   ;;  %s453_s15 = sshll.u32 %s622_s5, 4  ;;  %s454_s15 = int_to_ptr.hbm [resolvable:$true] %s453_s15 }
   0x7   :  { %57 = vmatpush.msra.mxu0 %v55_v0  ;;  %v53_v2 = vld [vmem:[#allocation2 + $0x68] sm:$0xff]  ;;  %v52_v3 = vld [vmem:[#allocation2 + $0x60] sm:$0xff]  ;;  %v51_v4 = vld [vmem:[#allocation2 + $0x58] sm:$0xff] }
   0x8   :  { %v50_v5 = vld [vmem:[#allocation2 + $0x50] sm:$0xff]  ;;  %v98_v6 = vld [vmem:[#allocation2 + $0xf8] sm:$0xff]  ;;  %v49_v8 = vld [vmem:[#allocation2 + $0x48] sm:$0xff] }
   0x9   :  { %58 = vmatpush.msra.mxu0 %v54_v1  ;;  %v97_v7 = vld [vmem:[#allocation2 + $0xf0] sm:$0xff]  ;;  %100 = vmatpush.msra.mxu1 %v98_v6  ;;  %v96_v9 = vld [vmem:[#allocation2 + $0xe8] sm:$0xff]  ;;  %v48_v10 = vld [vmem:[#allocation2 + $0x40] sm:$0xff] }
   0xa   :  { %v95_v11 = vld [vmem:[#allocation2 + $0xe0] sm:$0xff]  ;;  %v47_v12 = vld [vmem:[#allocation2 + $0x38] sm:$0xff]  ;;  %v46_v14 = vld [vmem:[#allocation2 + $0x30] sm:$0xff] }
   0xb   :  { %59 = vmatpush.msra.mxu0 %v53_v2  ;;  %101 = vmatpush.msra.mxu1 %v97_v7  ;;  %v94_v13 = vld [vmem:[#allocation2 + $0xd8] sm:$0xff]  ;;  %v93_v15 = vld [vmem:[#allocation2 + $0xd0] sm:$0xff]  ;;  %v45_v16 = vld [vmem:[#allocation2 + $0x28] sm:$0xff] }
   0xc   :  { %v92_v17 = vld [vmem:[#allocation2 + $0xc8] sm:$0xff]  ;;  %v44_v18 = vld [vmem:[#allocation2 + $0x20] sm:$0xff]  ;;  %v43_v20 = vld [vmem:[#allocation2 + $0x18] sm:$0xff] }
   0xd   :  { %60 = vmatpush.msra.mxu0 %v52_v3  ;;  %102 = vmatpush.msra.mxu1 %v96_v9  ;;  %v91_v19 = vld [vmem:[#allocation2 + $0xc0] sm:$0xff]  ;;  %v90_v21 = vld [vmem:[#allocation2 + $0xb8] sm:$0xff]  ;;  %v42_v22 = vld [vmem:[#allocation2 + $0x10] sm:$0xff] }
   0xe   :  { %v89_v23 = vld [vmem:[#allocation2 + $0xb0] sm:$0xff]  ;;  %v41_v24 = vld [vmem:[#allocation2 + $0x8] sm:$0xff]  ;;  %v40_v26 = vld [vmem:[#allocation2] sm:$0xff] }
   0xf   :  { %61 = vmatpush.msra.mxu0 %v51_v4  ;;  %103 = vmatpush.msra.mxu1 %v95_v11  ;;  %v88_v25 = vld [vmem:[#allocation2 + $0xa8] sm:$0xff]  ;;  %v87_v27 = vld [vmem:[#allocation2 + $0xa0] sm:$0xff]  ;;  %v86_v29 = vld [vmem:[#allocation2 + $0x98] sm:$0xff] }
  0x10   :  { %v38_v28 = vld [vmem:[%s617_s0] sm:$0xff]  ;;  %v39_v30 = vld [vmem:[%s617_s0 + $0x8] sm:$0xff]  ;;  %v85_v31 = vld [vmem:[#allocation2 + $0x90] sm:$0xff] }
  0x11   :  { %62 = vmatpush.msra.mxu0 %v50_v5  ;;  %104 = vmatpush.msra.mxu1 %v94_v13  ;;  %v84_v32 = vld [vmem:[#allocation2 + $0x88] sm:$0xff]  ;;  %v83_v33 = vld [vmem:[#allocation2 + $0x80] sm:$0xff]  ;;  %v141_v34 = vld [vmem:[#allocation2 + $0x178] sm:$0xff] }
  0x12   :  { %v182_v35 = vld [vmem:[#allocation2 + $0x1f8] sm:$0xff]  ;;  %v140_v36 = vld [vmem:[#allocation2 + $0x170] sm:$0xff]  ;;  %143 = vmatpush.msra.mxu2 %v141_v34  ;;  %v139_v38 = vld [vmem:[#allocation2 + $0x168] sm:$0xff] }
  0x13   :  { %63 = vmatpush.msra.mxu0 %v49_v8  ;;  %105 = vmatpush.msra.mxu1 %v93_v15  ;;  %v181_v37 = vld [vmem:[#allocation2 + $0x1f0] sm:$0xff]  ;;  %v180_v39 = vld [vmem:[#allocation2 + $0x1e8] sm:$0xff]  ;;  %v138_v40 = vld [vmem:[#allocation2 + $0x160] sm:$0xff] }
  0x14   :  { %184 = vmatpush.msra.mxu3 %v182_v35  ;;  %144 = vmatpush.msra.mxu2 %v140_v36  ;;  %v179_v41 = vld [vmem:[#allocation2 + $0x1e0] sm:$0xff]  ;;  %v137_v42 = vld [vmem:[#allocation2 + $0x158] sm:$0xff]  ;;  %v136_v44 = vld [vmem:[#allocation2 + $0x150] sm:$0xff] }
  0x15   :  { %64 = vmatpush.msra.mxu0 %v48_v10  ;;  %106 = vmatpush.msra.mxu1 %v92_v17  ;;  %v178_v43 = vld [vmem:[#allocation2 + $0x1d8] sm:$0xff]  ;;  %v177_v45 = vld [vmem:[#allocation2 + $0x1d0] sm:$0xff]  ;;  %v135_v46 = vld [vmem:[#allocation2 + $0x148] sm:$0xff] }
  0x16   :  { %185 = vmatpush.msra.mxu3 %v181_v37  ;;  %145 = vmatpush.msra.mxu2 %v139_v38  ;;  %v176_v47 = vld [vmem:[#allocation2 + $0x1c8] sm:$0xff]  ;;  %v134_v48 = vld [vmem:[#allocation2 + $0x140] sm:$0xff]  ;;  %v133_v51 = vld [vmem:[#allocation2 + $0x138] sm:$0xff] }
  0x17   :  { %65 = vmatpush.msra.mxu0 %v47_v12  ;;  %107 = vmatpush.msra.mxu1 %v91_v19  ;;  %v175_v49 = vld [vmem:[#allocation2 + $0x1c0] sm:$0xff]  ;;  %v174_v52 = vld [vmem:[#allocation2 + $0x1b8] sm:$0xff]  ;;  %v132_v54 = vld [vmem:[#allocation2 + $0x130] sm:$0xff] }
  0x18   :  { %186 = vmatpush.msra.mxu3 %v180_v39  ;;  %146 = vmatpush.msra.mxu2 %v138_v40  ;;  %v583_v50 = vld [vmem:[%s621_s4] sm:$0xff]  ;;  %v173_v55 = vld [vmem:[#allocation2 + $0x1b0] sm:$0xff]  ;;  %v131_v56 = vld [vmem:[#allocation2 + $0x128] sm:$0xff] }
  0x19   :  { %66 = vmatpush.msra.mxu0 %v46_v14  ;;  %108 = vmatpush.msra.mxu1 %v90_v21  ;;  %v56_v53 = vperm.slane %v583_v50, 0  ;;  %v172_v57 = vld [vmem:[#allocation2 + $0x1a8] sm:$0xff]  ;;  %v130_v60 = vld [vmem:[#allocation2 + $0x120] sm:$0xff]  ;;  %v129_v63 = vld [vmem:[#allocation2 + $0x118] sm:$0xff]  ;;  %v99_v10 = vperm.slane %v583_v50, 1 }
  0x1a   :  { %187 = vmatpush.msra.mxu3 %v179_v41  ;;  %147 = vmatpush.msra.mxu2 %v137_v42  ;;  %v171_v61 = vld [vmem:[#allocation2 + $0x1a0] sm:$0xff]  ;;  %v170_v0 = vld [vmem:[#allocation2 + $0x198] sm:$0xff]  ;;  %v128_v4 = vld [vmem:[#allocation2 + $0x110] sm:$0xff] }
  0x1b   :  { %67 = vmatpush.msra.mxu0 %v45_v16  ;;  %109 = vmatpush.msra.mxu1 %v89_v23  ;;  %v169_v5 = vld [vmem:[#allocation2 + $0x190] sm:$0xff]  ;;  %v127_v6 = vld [vmem:[#allocation2 + $0x108] sm:$0xff]  ;;  %v126_v8 = vld [vmem:[#allocation2 + $0x100] sm:$0xff] }
  0x1c   :  { %188 = vmatpush.msra.mxu3 %v178_v43  ;;  %148 = vmatpush.msra.mxu2 %v136_v44  ;;  %v168_v7 = vld [vmem:[#allocation2 + $0x188] sm:$0xff]  ;;  %v167_v9 = vld [vmem:[#allocation2 + $0x180] sm:$0xff]  ;;  %v309_v34 = vld [vmem:[#allocation2 + $0x270] sm:$0xff] }
  0x1d   :  { %68 = vmatpush.msra.mxu0 %v44_v18  ;;  %110 = vmatpush.msra.mxu1 %v88_v25  ;;  %v243_v17 = vld [vmem:[%s620_s3] sm:$0xff]  ;;  %v183_v18 = vperm.slane %v583_v50, 3  ;;  %v308_v40 = vld [vmem:[#allocation2 + $0x268] sm:$0xff] }
  0x1e   :  { %189 = vmatpush.msra.mxu3 %v177_v45  ;;  %149 = vmatpush.msra.mxu2 %v135_v46  ;;  %v235_v41 = vld [vmem:[%s618_s1] sm:$0xff] }
  0x1f   :  { %69 = vmatpush.msra.mxu0 %v43_v20  ;;  %111 = vmatpush.msra.mxu1 %v87_v27  ;;  %v307_v43 = vld [vmem:[#allocation2 + $0x260] sm:$0xff] }
  0x20   :  { %190 = vmatpush.msra.mxu3 %v176_v47  ;;  %150 = vmatpush.msra.mxu2 %v134_v48  ;;  %v306_v47 = vld [vmem:[#allocation2 + $0x258] sm:$0xff] }
  0x21   :  { %70 = vmatpush.msra.mxu0 %v42_v22  ;;  %112 = vmatpush.msra.mxu1 %v86_v29 }
  0x22   :  { %191 = vmatpush.msra.mxu3 %v175_v49  ;;  %151 = vmatpush.msra.mxu2 %v133_v51  ;;  %v305_v49 = vld [vmem:[#allocation2 + $0x250] sm:$0xff] }
  0x23   :  { %71 = vmatpush.msra.mxu0 %v41_v24  ;;  %113 = vmatpush.msra.mxu1 %v85_v31 }
  0x24   :  { %192 = vmatpush.msra.mxu3 %v174_v52  ;;  %152 = vmatpush.msra.mxu2 %v132_v54  ;;  %v304_v54 = vld [vmem:[#allocation2 + $0x248] sm:$0xff] }
  0x25   :  { %72 = vmatpush.msra.mxu0 %v40_v26  ;;  %114 = vmatpush.msra.mxu1 %v84_v32 }
  0x26   :  { %73 = vmatmul.f32.vlgmr.msra.gmra.mxu0 %v38_v28  ;;  %193 = vmatpush.msra.mxu3 %v173_v55  ;;  %v236_v55 = vld [vmem:[%s618_s1 + $0x8] sm:$0xff] }
  0x27   :  { %115 = vmatpush.msra.mxu1 %v83_v33  ;;  %153 = vmatpush.msra.mxu2 %v131_v56  ;;  %v310_v33 = vld [vmem:[#allocation2 + $0x278] sm:$0xff] }
  0x28   :  { %194 = vmatpush.msra.mxu3 %v172_v57  ;;  %272 = vmatpush.msrb.mxu0 %v243_v17  ;;  %v303_v57 = vld [vmem:[#allocation2 + $0x240] sm:$0xff] }
  0x29   :  { %154 = vmatpush.msra.mxu2 %v130_v60  ;;  %312 = vmatpush.msrb.mxu1 %v310_v33  ;;  %v302_v60 = vld [vmem:[#allocation2 + $0x238] sm:$0xff] }
  0x2a   :  { %195 = vmatpush.msra.mxu3 %v171_v61  ;;  %v301_v61 = vld [vmem:[#allocation2 + $0x230] sm:$0xff] }
  0x2b   :  { %155 = vmatpush.msra.mxu2 %v129_v63  ;;  %313 = vmatpush.msrb.mxu1 %v309_v34  ;;  %v237_v63 = vld [vmem:[%s618_s1 + $0x10] sm:$0xff]  ;;  %v349_v34 = vld [vmem:[#allocation2 + $0x298] sm:$0xff] }
  0x2c   :  { %196 = vmatpush.msra.mxu3 %v170_v0  ;;  %v299_v0 = vld [vmem:[#allocation2 + $0x220] sm:$0xff] }
  0x2d   :  { %156 = vmatpush.msra.mxu2 %v128_v4  ;;  %314 = vmatpush.msrb.mxu1 %v308_v40  ;;  %v346_v40 = vld [vmem:[#allocation2 + $0x280] sm:$0xff] }
  0x2e   :  { %76 = vmatmul.f32.gmra.mxu0 %v39_v30  ;;  %197 = vmatpush.msra.mxu3 %v169_v5  ;;  %v297_v5 = vld [vmem:[#allocation2 + $0x210] sm:$0xff] }
  0x2f   :  { %157 = vmatpush.msra.mxu2 %v127_v6  ;;  %315 = vmatpush.msrb.mxu1 %v307_v43  ;;  %v296_v6 = vld [vmem:[#allocation2 + $0x208] sm:$0xff]  ;;  %v411_v43 = vld [vmem:[#allocation2 + $0x370] sm:$0xff] }
  0x30   :  { %198 = vmatpush.msra.mxu3 %v168_v7  ;;  %v295_v7 = vld [vmem:[#allocation2 + $0x200] sm:$0xff] }
  0x31   :  { %158 = vmatpush.msra.mxu2 %v126_v8  ;;  %316 = vmatpush.msrb.mxu1 %v306_v47  ;;  %v409_v47 = vld [vmem:[#allocation2 + $0x360] sm:$0xff] }
  0x32   :  { %199 = vmatpush.msra.mxu3 %v167_v9  ;;  %v142_v9 = vperm.slane %v583_v50, 2 }
  0x33   :  { %317 = vmatpush.msrb.mxu1 %v305_v49  ;;  %v408_v49 = vld [vmem:[#allocation2 + $0x358] sm:$0xff] }
  0x35   :  { %318 = vmatpush.msrb.mxu1 %v304_v54 }
  0x37   :  { %319 = vmatpush.msrb.mxu1 %v303_v57  ;;  %v404_v57 = vld [vmem:[#allocation2 + $0x338] sm:$0xff] }
  0x39   :  { %320 = vmatpush.msrb.mxu1 %v302_v60 }
  0x3b   :  { %321 = vmatpush.msrb.mxu1 %v301_v61 }
  0xa3   :  { %v74_v58 = vpop.f32.mrf.mxu0 }
  0xa4   :  { %v75_v59 = vadd.f32 %v74_v58, %v56_v53 }
  0xa6   :  { %v80_v62 = vmax.f32 %v75_v59, 0.0 }
  0xa8   :  { %116 = vmatmul.f32.vlgmr.msra.gmra.mxu1 %v80_v62  ;;  %v300_v62 = vld [vmem:[#allocation2 + $0x228] sm:$0xff] }
  0xa9   :  { %322 = vmatpush.msrb.mxu1 %v300_v62  ;;  %v401_v62 = vld [vmem:[#allocation2 + $0x320] sm:$0xff] }
  0xab   :  { %v77_v1 = vpop.f32.mrf.mxu0  ;;  %323 = vmatpush.msrb.mxu1 %v299_v0  ;;  %v400_v0 = vld [vmem:[#allocation2 + $0x318] sm:$0xff] }
  0xac   :  { %v78_v2 = vadd.f32 %v77_v1, %v56_v53 }
  0xae   :  { %v81_v3 = vmax.f32 %v78_v2, 0.0  ;;  %v298_v2 = vld [vmem:[#allocation2 + $0x218] sm:$0xff] }
  0xaf   :  { %324 = vmatpush.msrb.mxu1 %v298_v2 }
  0xb0   :  { %119 = vmatmul.f32.gmra.mxu1 %v81_v3  ;;  %v238_v3 = vld [vmem:[%s618_s1 + $0x18] sm:$0xff]  ;;  %s537_s1 = smov [#allocation5]  }
  0xb1   :  { %325 = vmatpush.msrb.mxu1 %v297_v5  ;;  %v398_v5 = vld [vmem:[#allocation2 + $0x308] sm:$0xff]  ;;  %s451_s12 = sshll.u32 %s537_s1, 4  ;;  %s452_s12 = int_to_ptr.vmem [resolvable:$true] %s451_s12 }
  0xb3   :  { %326 = vmatpush.msrb.mxu1 %v296_v6  ;;  %v397_v6 = vld [vmem:[#allocation2 + $0x300] sm:$0xff] }
  0xb5   :  { %327 = vmatpush.msrb.mxu1 %v295_v7  ;;  %v362_v7 = vperm.slane %v583_v50, 5 }
 0x125   :  { %v117_v11 = vpop.f32.mrf.mxu1 }
 0x126   :  { %v118_v12 = vadd.f32 %v117_v11, %v99_v10  ;;  %v360_v11 = vld [vmem:[#allocation2 + $0x2f0] sm:$0xff] }
 0x128   :  { %v123_v13 = vmax.f32 %v118_v12, 0.0 }
 0x12a   :  { %159 = vmatmul.f32.vlgmr.msra.gmra.mxu2 %v123_v13  ;;  %200 = vmatmul.f32.vlgmr.msra.gmra.mxu3 %v123_v13  ;;  %v359_v13 = vld [vmem:[#allocation2 + $0x2e8] sm:$0xff] }
 0x12d   :  { %v120_v14 = vpop.f32.mrf.mxu1 }
 0x12e   :  { %v121_v15 = vadd.f32 %v120_v14, %v99_v10  ;;  %v361_v10 = vld [vmem:[#allocation2 + $0x2f8] sm:$0xff] }
 0x12f   :  { %363 = vmatpush.msrb.mxu2 %v361_v10 }
 0x130   :  { %v124_v16 = vmax.f32 %v121_v15, 0.0 }
 0x131   :  { %364 = vmatpush.msrb.mxu2 %v360_v11 }
 0x132   :  { %162 = vmatmul.f32.gmra.mxu2 %v124_v16  ;;  %203 = vmatmul.f32.gmra.mxu3 %v124_v16  ;;  %v358_v16 = vld [vmem:[#allocation2 + $0x2e0] sm:$0xff] }
 0x133   :  { %365 = vmatpush.msrb.mxu2 %v359_v13 }
 0x135   :  { %366 = vmatpush.msrb.mxu2 %v358_v16 }
 0x1ad   :  { %v201_v19 = vpop.f32.mrf.mxu3  ;;  %v160_v8 = vpop.f32.mrf.mxu2 }
 0x1ae   :  { %v202_v20 = vadd.f32 %v201_v19, %v183_v18  ;;  %v161_v12 = vadd.f32 %v160_v8, %v142_v9 }
 0x1b0   :  { %v209_v21 = vmin.f32 %v202_v20, 20.0  ;;  %vm207_vm1 = vcmp.gt.f32.partialorder %v202_v20, 20.0 }
 0x1b2   :  { %v211_v22 = vmul.f32 1.442695, %v209_v21 }
 0x1b4   :  { %474 = vpow2.f32 %v211_v22  ;;  %v355_v22 = vld [vmem:[#allocation2 + $0x2c8] sm:$0xff] }
 0x1b5   :  { %v204_v23 = vpop.f32.mrf.mxu3  ;;  %v163_v19 = vpop.f32.mrf.mxu2 }
 0x1b6   :  { %v205_v24 = vadd.f32 %v204_v23, %v183_v18  ;;  %v357_v18 = vld [vmem:[#allocation2 + $0x2d8] sm:$0xff]  ;;  %v164_v21 = vadd.f32 %v163_v19, %v142_v9 }
 0x1b7   :  { %367 = vmatpush.msrb.mxu2 %v357_v18 }
 0x1b8   :  { %v210_v25 = vmin.f32 %v205_v24, 20.0  ;;  %vm208_vm4 = vcmp.gt.f32.partialorder %v205_v24, 20.0 }
 0x1ba   :  { %v475_v26 = vpop.eup %474  ;;  %v213_v27 = vmul.f32 1.442695, %v210_v25  ;;  %v354_v25 = vld [vmem:[#allocation2 + $0x2c0] sm:$0xff] }
 0x1bb   :  { %v215_v28 = vadd.f32 1.0, %v475_v26  ;;  %v218_v29 = vmul.f32 -0.5, %v475_v26  ;;  %v221_v31 = vand.u32 2147483647, %v475_v26 }
 0x1bc   :  { %476 = vpow2.f32 %v213_v27  ;;  %v353_v27 = vld [vmem:[#allocation2 + $0x2b8] sm:$0xff] }
 0x1bd   :  { %478 = vlog2.f32 %v215_v28  ;;  %v219_v30 = vadd.f32 1.0, %v218_v29  ;;  %vm222_vm0 = vcmp.lt.f32.partialorder %v221_v31, 0.0004427343  ;;  %v352_v28 = vld [vmem:[#allocation2 + $0x2b0] sm:$0xff]  ;;  %v351_v29 = vld [vmem:[#allocation2 + $0x2a8] sm:$0xff] }
 0x1bf   :  { %v220_v38 = vmul.f32 %v475_v26, %v219_v30 }
 0x1c2   :  { %v477_v32 = vpop.eup %476 }
 0x1c3   :  { %v479_v35 = vpop.eup %478  ;;  %v224_v36 = vadd.f32 1.0, %v477_v32  ;;  %v227_v39 = vmul.f32 -0.5, %v477_v32  ;;  %v230_v48 = vand.u32 2147483647, %v477_v32 }
 0x1c4   :  { %v217_v37 = vmul.f32 0.6931472, %v479_v35 }
 0x1c5   :  { %480 = vlog2.f32 %v224_v36  ;;  %v228_v46 = vadd.f32 1.0, %v227_v39  ;;  %vm231_vm3 = vcmp.lt.f32.partialorder %v230_v48, 0.0004427343  ;;  %v347_v39 = vld [vmem:[#allocation2 + $0x288] sm:$0xff] }
 0x1c6   :  { %v223_v42 = vsel %vm222_vm0, %v220_v38, %v217_v37  ;;  %v348_v38 = vld [vmem:[#allocation2 + $0x290] sm:$0xff] }
 0x1c7   :  { %v233_v44 = vsel %vm207_vm1, %v202_v20, %v223_v42  ;;  %v229_v53 = vmul.f32 %v477_v32, %v228_v46  ;;  %v356_v20 = vld [vmem:[#allocation2 + $0x2d0] sm:$0xff]  ;;  %v350_v32 = vld [vmem:[#allocation2 + $0x2a0] sm:$0xff]  ;;  %v412_v42 = vld [vmem:[#allocation2 + $0x378] sm:$0xff] }
 0x1c8   :  { %v239_v45 = vmul.f32 %v235_v41, %v233_v44  ;;  %v241_v1 = vmul.f32 %v237_v63, %v233_v44  ;;  %368 = vmatpush.msrb.mxu2 %v356_v20  ;;  %v311_v41 = vperm.slane %v583_v50, 4  ;;  %414 = vmatpush.msrb.mxu3 %v412_v42  ;;  %v410_v44 = vld [vmem:[#allocation2 + $0x368] sm:$0xff]  ;;  %v413_v20 = vperm.slane %v583_v50, 6 }
 0x1ca   :  { %466 = vmatmul.msk.f32.vlgmr.msrb.gmra.mxu0 %vm244_vm2, %v239_v45  ;;  %369 = vmatpush.msrb.mxu2 %v355_v22 }
 0x1cb   :  { %v481_v51 = vpop.eup %480  ;;  %415 = vmatpush.msrb.mxu3 %v411_v43 }
 0x1cc   :  { %v226_v52 = vmul.f32 0.6931472, %v481_v51  ;;  %370 = vmatpush.msrb.mxu2 %v354_v25  ;;  %v407_v51 = vld [vmem:[#allocation2 + $0x350] sm:$0xff] }
 0x1cd   :  { %416 = vmatpush.msrb.mxu3 %v410_v44 }
 0x1ce   :  { %v232_v56 = vsel %vm231_vm3, %v229_v53, %v226_v52  ;;  %371 = vmatpush.msrb.mxu2 %v353_v27  ;;  %v406_v52 = vld [vmem:[#allocation2 + $0x348] sm:$0xff] }
 0x1cf   :  { %v234_v58 = vsel %vm208_vm4, %v205_v24, %v232_v56  ;;  %417 = vmatpush.msrb.mxu3 %v409_v47 }
 0x1d0   :  { %v240_v59 = vmul.f32 %v236_v55, %v234_v58  ;;  %v242_v4 = vmul.f32 %v238_v3, %v234_v58  ;;  %372 = vmatpush.msrb.mxu2 %v352_v28  ;;  %v405_v55 = vld [vmem:[#allocation2 + $0x340] sm:$0xff]  ;;  %v403_v58 = vld [vmem:[#allocation2 + $0x330] sm:$0xff] }
 0x1d1   :  { %418 = vmatpush.msrb.mxu3 %v408_v49 }
 0x1d2   :  { %467 = vmatmul.msk.f32.gmra.mxu0 %vm244_vm2, %v240_v59  ;;  %373 = vmatpush.msrb.mxu2 %v351_v29  ;;  %v402_v59 = vld [vmem:[#allocation2 + $0x328] sm:$0xff] }
 0x1d3   :  { %419 = vmatpush.msrb.mxu3 %v407_v51 }
 0x1d4   :  { %374 = vmatpush.msrb.mxu2 %v350_v32 }
 0x1d5   :  { %420 = vmatpush.msrb.mxu3 %v406_v52 }
 0x1d6   :  { %375 = vmatpush.msrb.mxu2 %v349_v34 }
 0x1d7   :  { %421 = vmatpush.msrb.mxu3 %v405_v55 }
 0x1d8   :  { %376 = vmatpush.msrb.mxu2 %v348_v38 }
 0x1d9   :  { %422 = vmatpush.msrb.mxu3 %v404_v57 }
 0x1da   :  { %468 = vmatmul.msk.f32.gmra.mxu0 %vm244_vm2, %v241_v1  ;;  %377 = vmatpush.msrb.mxu2 %v347_v39 }
 0x1db   :  { %423 = vmatpush.msrb.mxu3 %v403_v58 }
 0x1dc   :  { %378 = vmatpush.msrb.mxu2 %v346_v40 }
 0x1dd   :  { %424 = vmatpush.msrb.mxu3 %v402_v59 }
 0x1df   :  { %425 = vmatpush.msrb.mxu3 %v401_v62 }
 0x1e1   :  { %426 = vmatpush.msrb.mxu3 %v400_v0 }
 0x1e2   :  { %469 = vmatmul.msk.f32.gmra.mxu0 %vm244_vm2, %v242_v4  ;;  %v399_v4 = vld [vmem:[#allocation2 + $0x310] sm:$0xff] }
 0x1e3   :  { %427 = vmatpush.msrb.mxu3 %v399_v4 }
 0x1e5   :  { %428 = vmatpush.msrb.mxu3 %v398_v5 }
 0x1e7   :  { %429 = vmatpush.msrb.mxu3 %v397_v6 }
 0x247   :  { %v274_v14 = vpop.f32.mrf.mxu0 }
 0x248   :  { %v286_v15 = vadd.f32 %v274_v14, %v161_v12 }
 0x24a   :  { %v290_v17 = vmax.f32 %v286_v15, 0.0 }
 0x24c   :  { %328 = vmatmul.f32.vlgmr.msrb.gmra.mxu1 %v290_v17 }
 0x24f   :  { %v277_v23 = vpop.f32.mrf.mxu0 }
 0x250   :  { %v287_v24 = vadd.f32 %v277_v23, %v164_v21 }
 0x252   :  { %v291_v26 = vmax.f32 %v287_v24, 0.0 }
 0x254   :  { %331 = vmatmul.f32.gmra.mxu1 %v291_v26 }
 0x257   :  { %v280_v30 = vpop.f32.mrf.mxu0 }
 0x258   :  { %v288_v31 = vadd.f32 %v280_v30, %v161_v12 }
 0x25a   :  { %v292_v33 = vmax.f32 %v288_v31, 0.0 }
 0x25c   :  { %334 = vmatmul.f32.gmra.mxu1 %v292_v33 }
 0x25f   :  { %v283_v35 = vpop.f32.mrf.mxu0 }
 0x260   :  { %v289_v36 = vadd.f32 %v283_v35, %v164_v21 }
 0x262   :  { %v293_v37 = vmax.f32 %v289_v36, 0.0 }
 0x264   :  { %337 = vmatmul.f32.gmra.mxu1 %v293_v37 }
 0x2c9   :  { %v329_v45 = vpop.f32.mrf.mxu1 }
 0x2ca   :  { %v330_v46 = vadd.f32 %v329_v45, %v311_v41 }
 0x2cc   :  { %v341_v48 = vmax.f32 %v330_v46, 0.0 }
 0x2ce   :  { %379 = vmatmul.f32.vlgmr.msrb.gmra.mxu2 %v341_v48 }
 0x2d1   :  { %v332_v53 = vpop.f32.mrf.mxu1 }
 0x2d2   :  { %v333_v54 = vadd.f32 %v332_v53, %v311_v41 }
 0x2d4   :  { %v342_v56 = vmax.f32 %v333_v54, 0.0 }
 0x2d6   :  { %382 = vmatmul.f32.gmra.mxu2 %v342_v56 }
 0x2d9   :  { %v335_v60 = vpop.f32.mrf.mxu1 }
 0x2da   :  { %v336_v61 = vadd.f32 %v335_v60, %v311_v41 }
 0x2dc   :  { %v343_v63 = vmax.f32 %v336_v61, 0.0 }
 0x2de   :  { %385 = vmatmul.f32.gmra.mxu2 %v343_v63 }
 0x2e1   :  { %v338_v1 = vpop.f32.mrf.mxu1 }
 0x2e2   :  { %v339_v2 = vadd.f32 %v338_v1, %v311_v41 }
 0x2e4   :  { %v344_v3 = vmax.f32 %v339_v2, 0.0 }
 0x2e6   :  { %388 = vmatmul.f32.gmra.mxu2 %v344_v3 }
 0x351   :  { %v380_v8 = vpop.f32.mrf.mxu2 }
 0x352   :  { %v381_v9 = vadd.f32 %v380_v8, %v362_v7 }
 0x354   :  { %v392_v10 = vmax.f32 %v381_v9, 0.0 }
 0x356   :  { %430 = vmatmul.f32.vlgmr.msrb.gmra.mxu3 %v392_v10 }
 0x359   :  { %v383_v11 = vpop.f32.mrf.mxu2 }
 0x35a   :  { %v384_v12 = vadd.f32 %v383_v11, %v362_v7 }
 0x35c   :  { %v393_v13 = vmax.f32 %v384_v12, 0.0 }
 0x35e   :  { %433 = vmatmul.f32.gmra.mxu3 %v393_v13 }
 0x361   :  { %v386_v14 = vpop.f32.mrf.mxu2 }
 0x362   :  { %v387_v15 = vadd.f32 %v386_v14, %v362_v7 }
 0x364   :  { %v394_v16 = vmax.f32 %v387_v15, 0.0 }
 0x366   :  { %436 = vmatmul.f32.gmra.mxu3 %v394_v16 }
 0x369   :  { %v389_v17 = vpop.f32.mrf.mxu2 }
 0x36a   :  { %v390_v18 = vadd.f32 %v389_v17, %v362_v7 }
 0x36c   :  { %v395_v19 = vmax.f32 %v390_v18, 0.0 }
 0x36e   :  { %439 = vmatmul.f32.gmra.mxu3 %v395_v19 }
 0x3d9   :  { %v431_v21 = vpop.f32.mrf.mxu3 }
 0x3da   :  { %v432_v22 = vadd.f32 %v431_v21, %v413_v20 }
 0x3dc   :  { %443 = vst [vmem:[#allocation5] sm:$0xff] %v432_v22 }
 0x3e1   :  { %v434_v23 = vpop.f32.mrf.mxu3 }
 0x3e2   :  { %v435_v24 = vadd.f32 %v434_v23, %v413_v20 }
 0x3e4   :  { %444 = vst [vmem:[#allocation5 + $0x8] sm:$0xff] %v435_v24 }
 0x3e9   :  { %v437_v25 = vpop.f32.mrf.mxu3 }
 0x3ea   :  { %v438_v26 = vadd.f32 %v437_v25, %v413_v20 }
 0x3ec   :  { %445 = vst [vmem:[#allocation5 + $0x10] sm:$0xff] %v438_v26 }
 0x3f1   :  { %v440_v27 = vpop.f32.mrf.mxu3 }
 0x3f2   :  { %v441_v28 = vadd.f32 %v440_v27, %v413_v20 }
 0x3f4   :  { %446 = vst [vmem:[#allocation5 + $0x18] sm:$0xff] %v441_v28 }
 0x3f5   :  { %459 = dma.vmem_to_hbm [thread:$0]  %s452_s12, 512, %s454_s15, [#allocation4], %s535_s23, %s535_s23, %s536_s24  }
 0x3f6   :  { %532 = dma.done.wait [#allocation4], 512  }
 0x3f7   :  { %533 = vsyncadd [#allocation4], 4294966784 }
 0x3f8   :  { %464 = vsyncpa [#allocation3], 1 }
 0x3f9   :  { %465 = vsyncpa [#allocation4], 1 }

</bundles_post_ra>
